<compile_context>
chip_gen: v7x
topology: tpu7x:2x2x1
jax: 0.10.0
libtpu: 0.0.40
codegen_flags: <defaults>
</compile_context>

<pallas_src>
import jax
import jax.numpy as jnp
from jax import lax
from jax.experimental import pallas as pl
from jax.experimental.pallas import tpu as pltpu


_SUBLANE = 8                      # token-block granularity (f32 sublane tile)
_TOKENS_PER_BLOCK = 256           # rows gathered per grid step (multiple of 8)
_RESIDENT_TABLE_BYTES = 2 << 20   # tables <= 2 MiB take the VMEM-resident path


def _resident_gather_kernel(ids_ref, table_ref, out_ref):
    """Gather one token block from a VMEM-resident table via one-hot matmul.

    ids_ref:   VMEM (tn, 1)  int32  clamped token ids for this block
    table_ref: VMEM (V, E)           table, resident (constant block index)
    out_ref:   VMEM (tn, E)          gathered rows
    """
    ids = ids_ref[...]                                   # (tn, 1) int32
    tn = ids.shape[0]
    v = table_ref.shape[0]
    col = lax.broadcasted_iota(jnp.int32, (tn, v), 1)    # (tn, V)
    onehot = (col == ids).astype(table_ref.dtype)        # (tn, V)
    out_ref[...] = jnp.dot(
        onehot, table_ref[...], preferred_element_type=jnp.float32
    ).astype(out_ref.dtype)


def _hbm_gather_kernel(ids_ref, table_hbm, out_ref, sem):
    """DMA-gather one block of rows from the HBM table into the output tile.

    ids_ref:   SMEM (n_pad,) int32  scalar-prefetched (clamped) token ids
    table_hbm: HBM  (V, E)          embedding table (never staged whole)
    out_ref:   VMEM (tn, E)         output tile for this grid step
    sem:       single shared DMA semaphore (all copies are the same size)
    """
    i = pl.program_id(0)
    tn = out_ref.shape[0]

    # Issue all tn row copies first so they are in flight concurrently ...
    def issue(j, carry):
        row = ids_ref[i * tn + j]                        # scalar read, SMEM
        pltpu.make_async_copy(table_hbm.at[row], out_ref.at[j], sem).start()
        return carry

    lax.fori_loop(0, tn, issue, 0, unroll=_SUBLANE)

    # ... then retire them: each wait uses a same-shaped descriptor, so the
    # per-copy byte count matches; tn waits == tn completions.
    def drain(j, carry):
        pltpu.make_async_copy(table_hbm.at[0], out_ref.at[0], sem).wait()
        return carry

    lax.fori_loop(0, tn, drain, 0, unroll=_SUBLANE)


def embedding_forward(token_ids, embedding_table, *,
                      tokens_per_block=_TOKENS_PER_BLOCK,
                      resident_table_bytes=_RESIDENT_TABLE_BYTES,
                      force_hbm_gather=False):
    """Pallas-backed equivalent of `self.embedding_layer(token_ids)`.

    token_ids:       [B, S] integer token ids
    embedding_table: [V, E] float embedding weight
    returns:         [B, S, E] gathered embeddings (table dtype)
    """
    B, S = token_ids.shape
    V, E = embedding_table.shape
    N = B * S

    # torch nn.Embedding would raise on out-of-range ids; clamp instead so the
    # gather (VMEM read or HBM DMA) stays in bounds.  Semantic difference noted.
    ids = jnp.clip(token_ids.reshape(N).astype(jnp.int32), 0, V - 1)

    # Token block: multiple of 8 sublanes, no larger than the (rounded) token
    # count so tiny inputs do not over-pad.
    n_ceil8 = ((N + _SUBLANE - 1) // _SUBLANE) * _SUBLANE
    tn = ((tokens_per_block + _SUBLANE - 1) // _SUBLANE) * _SUBLANE
    tn = max(_SUBLANE, min(tn, n_ceil8))
    n_pad = ((N + tn - 1) // tn) * tn
    if n_pad != N:
        ids = jnp.pad(ids, (0, n_pad - N))     # padded tail gathers row 0
    grid = (n_pad // tn,)

    table_bytes = V * E * embedding_table.dtype.itemsize
    use_resident = (not force_hbm_gather) and table_bytes <= resident_table_bytes

    if use_resident:
        # Table DMA'd once (constant block index) and kept VMEM-resident.
        out = pl.pallas_call(
            _resident_gather_kernel,
            out_shape=jax.ShapeDtypeStruct((n_pad, E), embedding_table.dtype),
            grid=grid,
            in_specs=[
                pl.BlockSpec((tn, 1), lambda i: (i, 0)),      # ids block
                pl.BlockSpec((V, E), lambda i: (0, 0)),       # resident table
            ],
            out_specs=pl.BlockSpec((tn, E), lambda i: (i, 0)),
            compiler_params=pltpu.CompilerParams(
                dimension_semantics=("parallel",)),           # v7x: 2 TCs
        )(ids.reshape(n_pad, 1), embedding_table)
    else:
        # Per-row DMA gather; table stays unpadded in HBM.
        # TODO(synk): ids live in SMEM (pads to next_pow2(4*n_pad) bytes); for
        # very large B*S chunk the call instead of prefetching all ids at once.
        out = pl.pallas_call(
            _hbm_gather_kernel,
            out_shape=jax.ShapeDtypeStruct((n_pad, E), embedding_table.dtype),
            grid_spec=pltpu.PrefetchScalarGridSpec(
                num_scalar_prefetch=1,                        # ids -> SMEM
                grid=grid,
                in_specs=[pl.BlockSpec(memory_space=pl.ANY)], # table in HBM
                out_specs=pl.BlockSpec((tn, E), lambda i, ids_smem: (i, 0)),
                scratch_shapes=[pltpu.SemaphoreType.DMA(())],
            ),
            compiler_params=pltpu.CompilerParams(
                dimension_semantics=("parallel",)),
        )(ids, embedding_table)

    if n_pad != N:
        out = out[:N]
    return out.reshape(B, S, E)


class BaseModelPallas:
    """Mirror of BaseModel.__init__: holds embedding table / sizes / classes."""

    def __init__(self, embedding_table, num_classes):
        self.embedding_table = embedding_table            # nn.Embedding weight
        self.embedding_size = embedding_table.shape[1]    # self.embedding_size
        self.num_classes = num_classes                    # len(label2idx)

    def embed(self, token_ids):
        return embedding_forward(token_ids, self.embedding_table)

    def forward(self, inputs_data):
        # TODO(synk): BaseModel.forward is abstract in the PyTorch source;
        # subclasses provide the task head on top of self.embed().
        raise NotImplementedError


if __name__ == "__main__":
    # Small, deterministic shapes consistent with the module:
    #   batch B=2, seq S=8, vocab V=16, embedding_size E=32, num_classes=4
    B, S, V, E = 2, 8, 16, 32
    NUM_CLASSES = 4

    key = jax.random.PRNGKey(0)
    k_ids, k_tab = jax.random.split(key)

    token_ids = jax.random.randint(k_ids, (B, S), 0, V, dtype=jnp.int32)
    embedding_table = jax.random.normal(k_tab, (V, E), dtype=jnp.float32)

    model = BaseModelPallas(embedding_table, NUM_CLASSES)

    # Reference: plain-JAX gather (torch nn.Embedding semantics).
    ref = jnp.take(embedding_table, token_ids, axis=0)

    # 1) Resident-table fast path (table is 2 KiB -> lives in VMEM).
    out_res = jax.block_until_ready(model.embed(token_ids))
    assert out_res.shape == (B, S, E)
    assert jnp.allclose(out_res, ref, atol=1e-6), "resident path mismatch"

    # 2) HBM per-row DMA gather path (forced, to exercise the large-table path).
    out_hbm = jax.block_until_ready(
        embedding_forward(token_ids, embedding_table, force_hbm_gather=True))
    assert out_hbm.shape == (B, S, E)
    assert jnp.allclose(out_hbm, ref, atol=1e-6), "HBM gather path mismatch"

    print("KERNEL_OK")
</pallas_src>

<mosaic_0001>
module attributes {stable_mosaic.version = 11 : i64} {
  func.func @_resident_gather_kernel(%arg0: i32, %arg1: memref<16x1xi32, #tpu.memory_space<vmem>>, %arg2: memref<16x32xf32, #tpu.memory_space<vmem>>, %arg3: memref<16x32xf32, #tpu.memory_space<vmem>>) attributes {dimension_semantics = [#tpu.dimension_semantics<parallel>], iteration_bounds = array<i64: 1>, scalar_prefetch = 0 : i64, scratch_operands = 0 : i64, tpu.core_type = #tpu.core_type<tc>, window_params = [{transform_indices = @transform_0, window_bounds = array<i64: 16, 1>}, {pipeline_mode = #tpu.pipeline_mode<synchronous>, transform_indices = @transform_1, window_bounds = array<i64: 16, 32>}, {transform_indices = @transform_2, window_bounds = array<i64: 16, 32>}]} {
    %c0 = arith.constant 0 : index
    %c0_0 = arith.constant 0 : index
    %0 = vector.load %arg1[%c0, %c0_0] : memref<16x1xi32, #tpu.memory_space<vmem>>, vector<16x1xi32>
    %1 = tpu.iota {dimensions = array<i32: 1>} : vector<16x16xi32>
    %2 = vector.broadcast %0 : vector<16x1xi32> to vector<16x16xi32>
    %3 = arith.cmpi eq, %1, %2 : vector<16x16xi32>
    %4 = arith.extui %3 : vector<16x16xi1> to vector<16x16xi32>
    %5 = arith.sitofp %4 : vector<16x16xi32> to vector<16x16xf32>
    %c0_1 = arith.constant 0 : index
    %c0_2 = arith.constant 0 : index
    %6 = vector.load %arg2[%c0_1, %c0_2] : memref<16x32xf32, #tpu.memory_space<vmem>>, vector<16x32xf32>
    %cst = arith.constant dense<0.000000e+00> : vector<16x32xf32>
    %7 = tpu.matmul %5, %6, %cst {dimension_numbers = #tpu.dot_dimension_numbers<[1], [0], [0], [1], [0, 0, 1, 1], [], []>} : vector<16x16xf32>, vector<16x32xf32>, vector<16x32xf32> -> vector<16x32xf32>
    %c0_3 = arith.constant 0 : index
    %c0_4 = arith.constant 0 : index
    %8 = vector.load %arg3[%c0_3, %c0_4] : memref<16x32xf32, #tpu.memory_space<vmem>>, vector<16x32xf32>
    tpu.vector_store %arg3[%c0_3, %c0_4], %7 {strides = array<i32>} : memref<16x32xf32, #tpu.memory_space<vmem>>, vector<16x32xf32>,
    return
  }
  func.func @transform_0(%arg0: i32) -> (i32, i32) {
    %c0_i32 = arith.constant 0 : i32
    %c0_i32_0 = arith.constant 0 : i32
    return %arg0, %c0_i32 : i32, i32
  }
  func.func @transform_1(%arg0: i32) -> (i32, i32) {
    %c0_i32 = arith.constant 0 : i32
    %c0_i32_0 = arith.constant 0 : i32
    %c0_i32_1 = arith.constant 0 : i32
    return %c0_i32, %c0_i32_0 : i32, i32
  }
  func.func @transform_2(%arg0: i32) -> (i32, i32) {
    %c0_i32 = arith.constant 0 : i32
    %c0_i32_0 = arith.constant 0 : i32
    return %arg0, %c0_i32 : i32, i32
  }
}

</mosaic_0001>

<bundles_post_ra>
// kernel: tpu_custom_call.1
= control target key start
LH: loop header
LB: loop body
LE: loop exit
PB: predicated region body
PF: predicated region fallthrough
CT: control target
= control target key end

     0   :  { %s224_s0 = inlined_call_operand.vmem [shape: s32[16,1], index: 0, kind: input, shape index: {}]   ;;  %s225_s1 = inlined_call_operand.vmem [shape: f32[16,32], index: 1, kind: input, shape index: {}]   ;;  %s226_s2 = inlined_call_operand.hbm [shape: f32[16,32], index: 2, kind: output, shape index: {}]  }
   0x1   :  { %v12_v0 = vld [vmem:[%s224_s0] sm:$0xff] }
   0x2   :  { %7 = vsyncpa [#allocation3], 0  ;;  %v180_v1 = vmov 0   ;;  %v28_v2 = vld [vmem:[%s225_s1] sm:$0xff]  ;;  %v29_v3 = vld [vmem:[%s225_s1 + $0x8] sm:$0xff]  ;;  %v14_v6 = vlaneseq  ;;  %vm30_vm0 = vcmask 130048  }
   0x3   :  { %155 = vset.pattern.permute.xlu0 %v180_v1  ;;  %v146_v4 = vpack.c.bf16 %v29_v3, %v28_v2  ;;  %v13_v5 = vld [vmem:[%s224_s0 + $0x8] sm:$0xff]  ;;  %v181_v9 = vmov 0.0   ;;  %s182_s1 = smov [#allocation2]   ;;  %vm112_vm3 = vcmask 261120  }
   0x4   :  { %17 = vperm.xlu0 %155, %v12_v0   ;;  %v15_v7 = vand.u32 127, %v14_v6  ;;  %s120_s17 = sshll.u32 %s182_s1, 4  ;;  %s121_s17 = int_to_ptr.vmem [resolvable:$true] %s120_s17 }
   0x5   :  { %147 = vmatprep.subr.bf16.mxu0 %v146_v4  ;;  %s156_s0 = scalar_lea.vmem %s121_s17, 256  ;;  %p161_p1 = scmp.lt.s32.totalorder %s121_s17, %s121_s17 }
   0x6   :  { %149 = vmatpush3.bf16.msra.mxu0 %v146_v4  ;;  %p157_p0 = scmp.ne.s32.totalorder %s121_s17, %s156_s0  ;;  %p162_p2 = scmp.lt.s32.totalorder %s156_s0, %s156_s0 }
   0x8   :  { %20 = vperm.xlu0 %155, %v13_v5   ;;  %p163_p3 = por %p162_p2, %p161_p1 }
   0xa   :  { %p164_p4 = pnand %p163_p3, %p157_p0 }
  0x83   :  { %v18_v8 = vpop.permute.xlu0 %17 }
  0x84   :  { %vm22_vm1 = vcmp.eq.s32.totalorder %v15_v7, %v18_v8 }
  0x85   :  { %v131_v10 = vsel %vm22_vm1, 1.0, %v181_v9 }
  0x86   :  { %143 = vmatprep.mubr.msk.f32.mxu0 %vm30_vm0, %v131_v10 }
  0x87   :  { %v21_v11 = vpop.permute.xlu0 %20 }
  0x88   :  { %vm23_vm2 = vcmp.eq.s32.totalorder %v15_v7, %v21_v11 }
  0x89   :  { %v132_v12 = vsel %vm23_vm2, 1.0, %v181_v9 }
  0x8a   :  { %144 = vmatmul.mubr.msk.f32.vlgmr.msra.gmra.mrb[0].mxu0 %vm30_vm0, %v132_v12 }
 0x15d   :  { %v145_v13 = vpop.f32.mrb[0].mxu0 }
 0x15e   :  { %114 = vst.msk [vmem:[#allocation2 + $0x8] sm:$0xff] %vm112_vm3, %v145_v13  ;;  %v103_v14 = vpop.f32.mrb[1].mxu0 }
 0x15f   :  { %113 = vst.msk [vmem:[#allocation2] sm:$0xff] %vm112_vm3, %v103_v14 }
 0x160   :  { %167 = shalt.err (!%p164_p4)
}
 0x161   :  { %s168_s20 = scalar_lea.hbm %s226_s2, 256 }
 0x162   :  { %p169_p5 = scmp.ne.s32.totalorder %s226_s2, %s168_s20  ;;  %p172_p6 = scmp.lt.u32.totalorder %s168_s20, %s226_s2 }
 0x164   :  { %p174_p7 = pnand %p172_p6, %p169_p5 }
 0x166   :  { %177 = shalt.err (!%p174_p7)
}
 0x167   :  { %s183_s25 = smov 128   ;;  %s184_s26 = smov 8  }
 0x168   :  { %126 = dma.vmem_to_hbm [thread:$0]  %s121_s17, 256, %s226_s2, [#allocation3], %s183_s25, %s183_s25, %s184_s26  }
 0x169   :  { %178 = dma.done.wait [#allocation3], 256  }
 0x16a   :  { %179 = vsyncadd [#allocation3], 4294967040 }
 0x16b   :  { %130 = vsyncpa [#allocation3], 1 }

</bundles_post_ra>
